<compile_context>
chip_gen: v7x
topology: tpu7x:2x2x1
jax: 0.10.0
libtpu: 0.0.40
codegen_flags: <defaults>
</compile_context>

<pallas_src>
from functools import partial

import numpy as np
import jax
import jax.numpy as jnp
from jax import lax
from jax.experimental import pallas as pl
from jax.experimental.pallas import tpu as pltpu


# ----------------------------------------------------------------------------
# Host-side helpers
# ----------------------------------------------------------------------------
def compute_combinations(M, N):
    c = np.zeros((M + 1, N + 1), dtype=np.int64)
    c[:, 0] = 1
    for m in range(1, M + 1):
        for n in range(1, min(m, N) + 1):
            c[m, n] = c[m - 1, n - 1] + c[m - 1, n]
    return c


def _default_vmem_limit():
    # Generation-aware VMEM budget (v7x has 64 MiB / core, v5e/v6e have 128 MiB).
    try:
        cap = int(pltpu.get_tpu_info().vmem_capacity_bytes)
    except Exception:
        cap = 64 * 1024 * 1024
    return min(int(cap * 3 // 4), 100 * 1024 * 1024)


# ----------------------------------------------------------------------------
# Kernel A: combinadic index + validity (batch on lanes, int32)
# ----------------------------------------------------------------------------
def _index_kernel(x_ref, cu_ref, cd_ref, tri_ref, out_ref):
    # x_ref: (2, M_pad, TB) int32 (0/1), channel 0 = up, 1 = down
    # cu_ref/cd_ref: (M_pad, N+1) int32, c[i, n] = comb[M-1-i, n] (0 on padded rows)
    # tri_ref: (M_pad, M_pad) bf16, tri[i, j] = 1 if j < i
    # out_ref: (3, TB) int32 -> rows (i_up*valid, i_down*valid, valid)
    M_pad = x_ref.shape[1]
    TB = x_ref.shape[2]
    Nu = cu_ref.shape[1] - 1
    Nd = cd_ref.shape[1] - 1
    tri = tri_ref[...]                                   # (M_pad, M_pad) bf16

    def combinadic(x, c_ref, N):
        # x: (M_pad, TB) int32 0/1
        xb = x.astype(jnp.bfloat16)
        # exclusive prefix sum over sites via one MXU matmul (exact: counts <= M)
        excl = jnp.dot(tri, xb, preferred_element_type=jnp.float32)   # (M_pad, TB)
        left = N - excl.astype(jnp.int32)
        cval = jnp.zeros((M_pad, TB), jnp.int32)
        for n in range(N + 1):                           # static unroll over spin count
            col = c_ref[:, n:n + 1]                      # (M_pad, 1) int32
            cval = cval + jnp.where(left == n, col, 0)
        idx = jnp.sum(cval * x, axis=0, keepdims=True)   # (1, TB) int32
        tot = jnp.sum(x, axis=0, keepdims=True)          # (1, TB) int32
        return idx, tot

    xu = x_ref[0]                                        # (M_pad, TB)
    xd = x_ref[1]
    iu, su = combinadic(xu, cu_ref, Nu)
    idn, sd = combinadic(xd, cd_ref, Nd)

    valid = jnp.logical_and(su == Nu, sd == Nd).astype(jnp.int32)     # (1, TB)
    iu = iu * valid                                      # mirrors torch i * valid clamp
    idn = idn * valid

    row = lax.broadcasted_iota(jnp.int32, out_ref.shape, 0)           # (3, TB)
    out_ref[...] = jnp.where(row == 0, iu, jnp.where(row == 1, idn, valid))


# ----------------------------------------------------------------------------
# Kernel B: batched gather wave_function[i_up, i_down] with VMEM-resident W
# ----------------------------------------------------------------------------
def _gather_kernel(iu_ref, id_ref, vld_ref, w_ref, out_ref):
    # iu_ref/id_ref/vld_ref: (B_pad,) int32 in SMEM (scalar prefetch)
    # w_ref: (Su, 2, Sd) f32 — VMEM resident (constant index_map)
    # out_ref: (2, TB) f32 — row 0 = real, row 1 = imag
    TB = out_ref.shape[1]
    Sd = w_ref.shape[2]
    base = pl.program_id(0) * TB

    lane = lax.broadcasted_iota(jnp.int32, (2, Sd), 1)
    out_lane = lax.broadcasted_iota(jnp.int32, (2, TB), 1)

    def body(t, acc):
        iu = iu_ref[base + t]                            # scalar int32 (SMEM)
        idn = id_ref[base + t]
        v = vld_ref[base + t].astype(jnp.float32)
        row = w_ref[iu]                                  # (2, Sd) f32, dynamic sublane read
        sel = jnp.where(lane == idn, 1.0, 0.0)
        vals = jnp.sum(row * sel, axis=-1, keepdims=True) * v         # (2, 1)
        return jnp.where(out_lane == t, vals, acc)

    out_ref[...] = lax.fori_loop(0, TB, body, jnp.zeros((2, TB), jnp.float32))


# ----------------------------------------------------------------------------
# Jitted functional forward
# ----------------------------------------------------------------------------
@partial(jax.jit, static_argnames=("half_site", "spin_up", "spin_down"))
def _forward(x, comb_up_rt, comb_down_rt, tri, w_stack, *,
             half_site, spin_up, spin_down):
    B = x.shape[0]
    M = half_site
    M_pad = tri.shape[0]
    Nu, Nd = spin_up, spin_down
    Su, _, Sd = w_stack.shape

    TB = 512 if B >= 512 else 128
    B_pad = ((B + TB - 1) // TB) * TB

    # flatten + deinterleave up/down, put batch on the (lane) trailing axis
    xf = jnp.reshape(x, (B, -1)).astype(jnp.int32)       # (B, 2M)
    xr = jnp.reshape(xf, (B, M, 2))
    xT = jnp.transpose(xr, (2, 1, 0))                    # (2, M, B)
    xT = jnp.pad(xT, ((0, 0), (0, M_pad - M), (0, B_pad - B)))

    vmem_limit = _default_vmem_limit()

    # ---- Kernel A: combinadic indices + validity, lane-dense (3, B_pad) -----
    idx = pl.pallas_call(
        _index_kernel,
        out_shape=jax.ShapeDtypeStruct((3, B_pad), jnp.int32),
        grid_spec=pltpu.PrefetchScalarGridSpec(
            num_scalar_prefetch=0,
            grid=(B_pad // TB,),
            in_specs=[
                pl.BlockSpec((2, M_pad, TB), lambda i: (0, 0, i)),
                pl.BlockSpec((M_pad, Nu + 1), lambda i: (0, 0)),
                pl.BlockSpec((M_pad, Nd + 1), lambda i: (0, 0)),
                pl.BlockSpec((M_pad, M_pad), lambda i: (0, 0)),
            ],
            out_specs=pl.BlockSpec((3, TB), lambda i: (0, i)),
        ),
        compiler_params=pltpu.CompilerParams(
            dimension_semantics=("parallel",),
            vmem_limit_bytes=vmem_limit),
    )(xT, comb_up_rt, comb_down_rt, tri)

    i_up = idx[0]
    i_down = idx[1]
    valid = idx[2]

    # ---- Kernel B: batched gather, W resident in VMEM, lane-dense output ----
    out = pl.pallas_call(
        _gather_kernel,
        out_shape=jax.ShapeDtypeStruct((2, B_pad), jnp.float32),
        grid_spec=pltpu.PrefetchScalarGridSpec(
            num_scalar_prefetch=3,                       # i_up, i_down, valid -> SMEM
            grid=(B_pad // TB,),
            in_specs=[
                pl.BlockSpec((Su, 2, Sd), lambda i, iu, idn, vld: (0, 0, 0)),
            ],
            out_specs=pl.BlockSpec((2, TB), lambda i, iu, idn, vld: (0, i)),
        ),
        compiler_params=pltpu.CompilerParams(
            dimension_semantics=("parallel",),
            vmem_limit_bytes=vmem_limit),
    )(i_up, i_down, valid, w_stack)

    out = out[:, :B]                                     # drop batch padding
    return lax.complex(out[0], out[1])                   # complex64, shape (B,)


# ----------------------------------------------------------------------------
# Module wrapper
# ----------------------------------------------------------------------------
class ComplexWaveFunctionPallas:
    def __init__(self, L1, L2, orbit, dimension, spin_up, spin_down, key):
        assert dimension == 2
        self.half_site = L1 * L2 * orbit // 2
        self.spin_up = spin_up
        self.spin_down = spin_down
        M = self.half_site
        self.M_pad = max(8, ((M + 7) // 8) * 8)

        comb_up = compute_combinations(M, spin_up)
        comb_down = compute_combinations(M, spin_down)
        self.comb_up_np = comb_up
        self.comb_down_np = comb_down
        self.space_up = int(comb_up[M, spin_up])
        self.space_down = int(comb_down[M, spin_down])

        # Reversed comb tables: rt[i, n] = comb[M-1-i, n]; rows >= M are zero padding.
        # TODO(synk): int32 overflows for half_site >= ~34 (comb values > 2^31).
        def rev_table(comb, N):
            rt = np.zeros((self.M_pad, N + 1), np.int32)
            rt[:M] = comb[M - 1::-1, :]
            return jnp.asarray(rt)

        self.comb_up_rt = rev_table(comb_up, spin_up)
        self.comb_down_rt = rev_table(comb_down, spin_down)

        # strictly-lower-triangular matrix: tri[i, j] = 1 if j < i (exclusive prefix sum).
        # bf16 is exact here (entries 0/1, partial sums <= half_site) and is a single
        # MXU pass on v5e/v6e/v7x.
        tri = np.tril(np.ones((self.M_pad, self.M_pad), np.float32), k=-1)
        self.tri = jnp.asarray(tri, jnp.bfloat16)

        k1, k2 = jax.random.split(key)
        self.w_real = jax.random.normal(k1, (self.space_up, self.space_down), jnp.float32)
        self.w_imag = jax.random.normal(k2, (self.space_up, self.space_down), jnp.float32)
        # (Su, 2, Sd): one dynamic sublane read fetches both real & imag rows.
        self.w_stack = jnp.stack([self.w_real, self.w_imag], axis=1)

    def __call__(self, x):
        return _forward(x, self.comb_up_rt, self.comb_down_rt, self.tri, self.w_stack,
                        half_site=self.half_site,
                        spin_up=self.spin_up,
                        spin_down=self.spin_down)


# ----------------------------------------------------------------------------
# Pure-numpy reference (port of the torch forward)
# ----------------------------------------------------------------------------
def reference(x, comb_up, comb_down, w_real, w_imag, half_site, spin_up, spin_down):
    x = np.asarray(x).reshape(x.shape[0], -1).astype(np.int64)
    x_up = x[:, 0::2]
    x_down = x[:, 1::2]

    def mapping(xs, comb, M, N):
        index = np.zeros(xs.shape[0], np.int64)
        left = np.full(xs.shape[0], N, np.int64)
        for i in range(M):
            xi = xs[:, i]
            lookup = comb[M - 1 - i, np.clip(left, 0, N)]
            index = index + lookup * xi
            left = left - xi
        return index

    i_up = mapping(x_up, comb_up, half_site, spin_up)
    i_down = mapping(x_down, comb_down, half_site, spin_down)
    valid = (x_up.sum(-1) == spin_up) & (x_down.sum(-1) == spin_down)
    iu = np.where(valid, i_up, 0)
    idn = np.where(valid, i_down, 0)
    wr = np.where(valid, w_real[iu, idn], 0.0)
    wi = np.where(valid, w_imag[iu, idn], 0.0)
    return wr + 1j * wi


# ----------------------------------------------------------------------------
if __name__ == "__main__":
    L1, L2, orbit, dimension = 2, 2, 2, 2
    spin_up, spin_down = 2, 2
    B = 8

    key = jax.random.PRNGKey(0)
    kx, kp = jax.random.split(key)

    model = ComplexWaveFunctionPallas(L1, L2, orbit, dimension,
                                      spin_up, spin_down, kp)

    x = jax.random.bernoulli(kx, 0.5, (B, L1, L2, orbit)).astype(jnp.int32)
    # force one valid and one definitely-invalid configuration
    valid_row = jnp.asarray([1, 1, 1, 1, 0, 0, 0, 0], jnp.int32).reshape(L1, L2, orbit)
    x = x.at[0].set(valid_row)
    x = x.at[1].set(jnp.ones((L1, L2, orbit), jnp.int32))

    out = jax.block_until_ready(model(x))

    ref = reference(np.asarray(x), model.comb_up_np, model.comb_down_np,
                    np.asarray(model.w_real), np.asarray(model.w_imag),
                    model.half_site, spin_up, spin_down)

    assert out.shape == (B,) and out.dtype == jnp.complex64
    assert np.allclose(np.asarray(out), ref.astype(np.complex64), atol=1e-6, rtol=1e-6), \
        f"mismatch:\n{np.asarray(out)}\nvs\n{ref}"

    print("KERNEL_OK")
</pallas_src>

<mosaic_0001>
module attributes {stable_mosaic.version = 11 : i64} {
  func.func @_index_kernel(%arg0: i32, %arg1: memref<2x8x128xi32, #tpu.memory_space<vmem>>, %arg2: memref<8x3xi32, #tpu.memory_space<vmem>>, %arg3: memref<8x3xi32, #tpu.memory_space<vmem>>, %arg4: memref<8x8xbf16, #tpu.memory_space<vmem>>, %arg5: memref<3x128xi32, #tpu.memory_space<vmem>>) attributes {dimension_semantics = [#tpu.dimension_semantics<parallel>], iteration_bounds = array<i64: 1>, scalar_prefetch = 0 : i64, scratch_operands = 0 : i64, tpu.core_type = #tpu.core_type<tc>, window_params = [{transform_indices = @transform_0, window_bounds = array<i64: 2, 8, 128>}, {pipeline_mode = #tpu.pipeline_mode<synchronous>, transform_indices = @transform_1, window_bounds = array<i64: 8, 3>}, {pipeline_mode = #tpu.pipeline_mode<synchronous>, transform_indices = @transform_2, window_bounds = array<i64: 8, 3>}, {pipeline_mode = #tpu.pipeline_mode<synchronous>, transform_indices = @transform_3, window_bounds = array<i64: 8, 8>}, {transform_indices = @transform_4, window_bounds = array<i64: 3, 128>}]} {
    %c0 = arith.constant 0 : index
    %c0_0 = arith.constant 0 : index
    %0 = vector.load %arg4[%c0, %c0_0] : memref<8x8xbf16, #tpu.memory_space<vmem>>, vector<8x8xbf16>
    %c0_1 = arith.constant 0 : index
    %c0_2 = arith.constant 0 : index
    %c0_3 = arith.constant 0 : index
    %1 = vector.load %arg1[%c0_1, %c0_2, %c0_3] : memref<2x8x128xi32, #tpu.memory_space<vmem>>, vector<1x8x128xi32>
    %2 = vector.shape_cast %1 : vector<1x8x128xi32> to vector<8x128xi32>
    %c1 = arith.constant 1 : index
    %c0_4 = arith.constant 0 : index
    %c0_5 = arith.constant 0 : index
    %3 = vector.load %arg1[%c1, %c0_4, %c0_5] : memref<2x8x128xi32, #tpu.memory_space<vmem>>, vector<1x8x128xi32>
    %4 = vector.shape_cast %3 : vector<1x8x128xi32> to vector<8x128xi32>
    %5 = arith.sitofp %2 : vector<8x128xi32> to vector<8x128xbf16>
    %cst = arith.constant dense<0.000000e+00> : vector<8x128xf32>
    %6 = tpu.matmul %0, %5, %cst {dimension_numbers = #tpu.dot_dimension_numbers<[1], [0], [0], [1], [0, 0, 1, 1], [], []>} : vector<8x8xbf16>, vector<8x128xbf16>, vector<8x128xf32> -> vector<8x128xf32>
    %7 = arith.fptosi %6 : vector<8x128xf32> to vector<8x128xi32>
    %c2_i32 = arith.constant 2 : i32
    %8 = vector.broadcast %c2_i32 : i32 to vector<8x128xi32>
    %9 = arith.subi %8, %7 : vector<8x128xi32>
    %c0_i32 = arith.constant 0 : i32
    %10 = vector.broadcast %c0_i32 : i32 to vector<8x128xi32>
    %c0_6 = arith.constant 0 : index
    %c0_7 = arith.constant 0 : index
    %11 = vector.load %arg2[%c0_6, %c0_7] : memref<8x3xi32, #tpu.memory_space<vmem>>, vector<8x1xi32>
    %c0_i32_8 = arith.constant 0 : i32
    %12 = vector.broadcast %c0_i32_8 : i32 to vector<8x128xi32>
    %13 = arith.cmpi eq, %9, %12 : vector<8x128xi32>
    %c0_i32_9 = arith.constant 0 : i32
    %14 = vector.shape_cast %11 : vector<8x1xi32> to vector<8x1xi32>
    %15 = vector.broadcast %14 : vector<8x1xi32> to vector<8x128xi32>
    %16 = vector.broadcast %c0_i32_9 : i32 to vector<8x128xi32>
    %17 = arith.select %13, %15, %16 : vector<8x128xi1>, vector<8x128xi32>
    %18 = arith.addi %10, %17 : vector<8x128xi32>
    %c0_10 = arith.constant 0 : index
    %c1_11 = arith.constant 1 : index
    %19 = vector.load %arg2[%c0_10, %c1_11] : memref<8x3xi32, #tpu.memory_space<vmem>>, vector<8x1xi32>
    %c1_i32 = arith.constant 1 : i32
    %20 = vector.broadcast %c1_i32 : i32 to vector<8x128xi32>
    %21 = arith.cmpi eq, %9, %20 : vector<8x128xi32>
    %c0_i32_12 = arith.constant 0 : i32
    %22 = vector.shape_cast %19 : vector<8x1xi32> to vector<8x1xi32>
    %23 = vector.broadcast %22 : vector<8x1xi32> to vector<8x128xi32>
    %24 = vector.broadcast %c0_i32_12 : i32 to vector<8x128xi32>
    %25 = arith.select %21, %23, %24 : vector<8x128xi1>, vector<8x128xi32>
    %26 = arith.addi %18, %25 : vector<8x128xi32>
    %c0_13 = arith.constant 0 : index
    %c2 = arith.constant 2 : index
    %27 = vector.load %arg2[%c0_13, %c2] : memref<8x3xi32, #tpu.memory_space<vmem>>, vector<8x1xi32>
    %c2_i32_14 = arith.constant 2 : i32
    %28 = vector.broadcast %c2_i32_14 : i32 to vector<8x128xi32>
    %29 = arith.cmpi eq, %9, %28 : vector<8x128xi32>
    %c0_i32_15 = arith.constant 0 : i32
    %30 = vector.shape_cast %27 : vector<8x1xi32> to vector<8x1xi32>
    %31 = vector.broadcast %30 : vector<8x1xi32> to vector<8x128xi32>
    %32 = vector.broadcast %c0_i32_15 : i32 to vector<8x128xi32>
    %33 = arith.select %29, %31, %32 : vector<8x128xi1>, vector<8x128xi32>
    %34 = arith.addi %26, %33 : vector<8x128xi32>
    %35 = arith.muli %34, %2 : vector<8x128xi32>
    %cst_16 = arith.constant dense<0> : vector<128xi32>
    %36 = vector.multi_reduction <add>, %35, %cst_16 [0] : vector<8x128xi32> to vector<128xi32>
    %37 = vector.shape_cast %36 : vector<128xi32> to vector<1x128xi32>
    %cst_17 = arith.constant dense<0> : vector<128xi32>
    %38 = vector.multi_reduction <add>, %2, %cst_17 [0] : vector<8x128xi32> to vector<128xi32>
    %39 = vector.shape_cast %38 : vector<128xi32> to vector<1x128xi32>
    %40 = arith.sitofp %4 : vector<8x128xi32> to vector<8x128xbf16>
    %cst_18 = arith.constant dense<0.000000e+00> : vector<8x128xf32>
    %41 = tpu.matmul %0, %40, %cst_18 {dimension_numbers = #tpu.dot_dimension_numbers<[1], [0], [0], [1], [0, 0, 1, 1], [], []>} : vector<8x8xbf16>, vector<8x128xbf16>, vector<8x128xf32> -> vector<8x128xf32>
    %42 = arith.fptosi %41 : vector<8x128xf32> to vector<8x128xi32>
    %c2_i32_19 = arith.constant 2 : i32
    %43 = vector.broadcast %c2_i32_19 : i32 to vector<8x128xi32>
    %44 = arith.subi %43, %42 : vector<8x128xi32>
    %c0_i32_20 = arith.constant 0 : i32
    %45 = vector.broadcast %c0_i32_20 : i32 to vector<8x128xi32>
    %c0_21 = arith.constant 0 : index
    %c0_22 = arith.constant 0 : index
    %46 = vector.load %arg3[%c0_21, %c0_22] : memref<8x3xi32, #tpu.memory_space<vmem>>, vector<8x1xi32>
    %c0_i32_23 = arith.constant 0 : i32
    %47 = vector.broadcast %c0_i32_23 : i32 to vector<8x128xi32>
    %48 = arith.cmpi eq, %44, %47 : vector<8x128xi32>
    %c0_i32_24 = arith.constant 0 : i32
    %49 = vector.shape_cast %46 : vector<8x1xi32> to vector<8x1xi32>
    %50 = vector.broadcast %49 : vector<8x1xi32> to vector<8x128xi32>
    %51 = vector.broadcast %c0_i32_24 : i32 to vector<8x128xi32>
    %52 = arith.select %48, %50, %51 : vector<8x128xi1>, vector<8x128xi32>
    %53 = arith.addi %45, %52 : vector<8x128xi32>
    %c0_25 = arith.constant 0 : index
    %c1_26 = arith.constant 1 : index
    %54 = vector.load %arg3[%c0_25, %c1_26] : memref<8x3xi32, #tpu.memory_space<vmem>>, vector<8x1xi32>
    %c1_i32_27 = arith.constant 1 : i32
    %55 = vector.broadcast %c1_i32_27 : i32 to vector<8x128xi32>
    %56 = arith.cmpi eq, %44, %55 : vector<8x128xi32>
    %c0_i32_28 = arith.constant 0 : i32
    %57 = vector.shape_cast %54 : vector<8x1xi32> to vector<8x1xi32>
    %58 = vector.broadcast %57 : vector<8x1xi32> to vector<8x128xi32>
    %59 = vector.broadcast %c0_i32_28 : i32 to vector<8x128xi32>
    %60 = arith.select %56, %58, %59 : vector<8x128xi1>, vector<8x128xi32>
    %61 = arith.addi %53, %60 : vector<8x128xi32>
    %c0_29 = arith.constant 0 : index
    %c2_30 = arith.constant 2 : index
    %62 = vector.load %arg3[%c0_29, %c2_30] : memref<8x3xi32, #tpu.memory_space<vmem>>, vector<8x1xi32>
    %c2_i32_31 = arith.constant 2 : i32
    %63 = vector.broadcast %c2_i32_31 : i32 to vector<8x128xi32>
    %64 = arith.cmpi eq, %44, %63 : vector<8x128xi32>
    %c0_i32_32 = arith.constant 0 : i32
    %65 = vector.shape_cast %62 : vector<8x1xi32> to vector<8x1xi32>
    %66 = vector.broadcast %65 : vector<8x1xi32> to vector<8x128xi32>
    %67 = vector.broadcast %c0_i32_32 : i32 to vector<8x128xi32>
    %68 = arith.select %64, %66, %67 : vector<8x128xi1>, vector<8x128xi32>
    %69 = arith.addi %61, %68 : vector<8x128xi32>
    %70 = arith.muli %69, %4 : vector<8x128xi32>
    %cst_33 = arith.constant dense<0> : vector<128xi32>
    %71 = vector.multi_reduction <add>, %70, %cst_33 [0] : vector<8x128xi32> to vector<128xi32>
    %72 = vector.shape_cast %71 : vector<128xi32> to vector<1x128xi32>
    %cst_34 = arith.constant dense<0> : vector<128xi32>
    %73 = vector.multi_reduction <add>, %4, %cst_34 [0] : vector<8x128xi32> to vector<128xi32>
    %74 = vector.shape_cast %73 : vector<128xi32> to vector<1x128xi32>
    %c2_i32_35 = arith.constant 2 : i32
    %75 = vector.broadcast %c2_i32_35 : i32 to vector<1x128xi32>
    %76 = arith.cmpi eq, %39, %75 : vector<1x128xi32>
    %c2_i32_36 = arith.constant 2 : i32
    %77 = vector.broadcast %c2_i32_36 : i32 to vector<1x128xi32>
    %78 = arith.cmpi eq, %74, %77 : vector<1x128xi32>
    %79 = arith.andi %76, %78 : vector<1x128xi1>
    %80 = arith.extui %79 : vector<1x128xi1> to vector<1x128xi32>
    %81 = arith.muli %37, %80 : vector<1x128xi32>
    %82 = arith.muli %72, %80 : vector<1x128xi32>
    %83 = tpu.iota {dimensions = array<i32: 0>} : vector<3x128xi32>
    %c0_i32_37 = arith.constant 0 : i32
    %84 = vector.broadcast %c0_i32_37 : i32 to vector<3x128xi32>
    %85 = arith.cmpi eq, %83, %84 : vector<3x128xi32>
    %c1_i32_38 = arith.constant 1 : i32
    %86 = vector.broadcast %c1_i32_38 : i32 to vector<3x128xi32>
    %87 = arith.cmpi eq, %83, %86 : vector<3x128xi32>
    %88 = vector.shape_cast %82 : vector<1x128xi32> to vector<1x128xi32>
    %89 = vector.broadcast %88 : vector<1x128xi32> to vector<3x128xi32>
    %90 = vector.shape_cast %80 : vector<1x128xi32> to vector<1x128xi32>
    %91 = vector.broadcast %90 : vector<1x128xi32> to vector<3x128xi32>
    %92 = arith.select %87, %89, %91 : vector<3x128xi1>, vector<3x128xi32>
    %93 = vector.shape_cast %81 : vector<1x128xi32> to vector<1x128xi32>
    %94 = vector.broadcast %93 : vector<1x128xi32> to vector<3x128xi32>
    %95 = arith.select %85, %94, %92 : vector<3x128xi1>, vector<3x128xi32>
    %c0_39 = arith.constant 0 : index
    %c0_40 = arith.constant 0 : index
    %96 = vector.load %arg5[%c0_39, %c0_40] : memref<3x128xi32, #tpu.memory_space<vmem>>, vector<3x128xi32>
    tpu.vector_store %arg5[%c0_39, %c0_40], %95 {strides = array<i32>} : memref<3x128xi32, #tpu.memory_space<vmem>>, vector<3x128xi32>,
    return
  }
  func.func @transform_0(%arg0: i32) -> (i32, i32, i32) {
    %c0_i32 = arith.constant 0 : i32
    %c0_i32_0 = arith.constant 0 : i32
    %c0_i32_1 = arith.constant 0 : i32
    return %c0_i32, %c0_i32_0, %arg0 : i32, i32, i32
  }
  func.func @transform_1(%arg0: i32) -> (i32, i32) {
    %c0_i32 = arith.constant 0 : i32
    %c0_i32_0 = arith.constant 0 : i32
    %c0_i32_1 = arith.constant 0 : i32
    return %c0_i32, %c0_i32_0 : i32, i32
  }
  func.func @transform_2(%arg0: i32) -> (i32, i32) {
    %c0_i32 = arith.constant 0 : i32
    %c0_i32_0 = arith.constant 0 : i32
    %c0_i32_1 = arith.constant 0 : i32
    return %c0_i32, %c0_i32_0 : i32, i32
  }
  func.func @transform_3(%arg0: i32) -> (i32, i32) {
    %c0_i32 = arith.constant 0 : i32
    %c0_i32_0 = arith.constant 0 : i32
    %c0_i32_1 = arith.constant 0 : i32
    return %c0_i32, %c0_i32_0 : i32, i32
  }
  func.func @transform_4(%arg0: i32) -> (i32, i32) {
    %c0_i32 = arith.constant 0 : i32
    %c0_i32_0 = arith.constant 0 : i32
    return %c0_i32, %arg0 : i32, i32
  }
}

module attributes {stable_mosaic.version = 11 : i64} {
  func.func @_gather_kernel(%arg0: i32, %arg1: memref<128xi32, #tpu.memory_space<smem>>, %arg2: memref<128xi32, #tpu.memory_space<smem>>, %arg3: memref<128xi32, #tpu.memory_space<smem>>, %arg4: memref<6x2x6xf32, #tpu.memory_space<vmem>>, %arg5: memref<2x128xf32, #tpu.memory_space<vmem>>) attributes {dimension_semantics = [#tpu.dimension_semantics<parallel>], iteration_bounds = array<i64: 1>, scalar_prefetch = 3 : i64, scratch_operands = 0 : i64, tpu.core_type = #tpu.core_type<tc>, window_params = [{pipeline_mode = #tpu.pipeline_mode<synchronous>, transform_indices = @transform_0, window_bounds = array<i64: 6, 2, 6>}, {transform_indices = @transform_1, window_bounds = array<i64: 2, 128>}]} {
    %c128_i32 = arith.constant 128 : i32
    %0 = arith.muli %arg0, %c128_i32 : i32
    %1 = tpu.iota {dimensions = array<i32: 1>} : vector<2x6xi32>
    %2 = tpu.iota {dimensions = array<i32: 1>} : vector<2x128xi32>
    %cst = arith.constant 0.000000e+00 : f32
    %3 = vector.broadcast %cst : f32 to vector<2x128xf32>
    %c0_i32 = arith.constant 0 : i32
    %c128_i32_0 = arith.constant 128 : i32
    %4 = arith.addi %c0_i32, %c128_i32_0 : i32
    %c1_i32 = arith.constant 1 : i32
    %5 = scf.for %arg6 = %c0_i32 to %4 step %c1_i32 iter_args(%arg7 = %3) -> (vector<2x128xf32>)  : i32 {
      %7 = arith.addi %0, %arg6 : i32
      %8 = arith.index_cast %7 : i32 to index
      %9 = memref.load %arg1[%8] : memref<128xi32, #tpu.memory_space<smem>>
      %10 = arith.addi %0, %arg6 : i32
      %11 = arith.index_cast %10 : i32 to index
      %12 = memref.load %arg2[%11] : memref<128xi32, #tpu.memory_space<smem>>
      %13 = arith.addi %0, %arg6 : i32
      %14 = arith.index_cast %13 : i32 to index
      %15 = memref.load %arg3[%14] : memref<128xi32, #tpu.memory_space<smem>>
      %16 = arith.sitofp %15 : i32 to f32
      %17 = arith.index_cast %9 : i32 to index
      %c0_3 = arith.constant 0 : index
      %c0_4 = arith.constant 0 : index
      %18 = vector.load %arg4[%17, %c0_3, %c0_4] : memref<6x2x6xf32, #tpu.memory_space<vmem>>, vector<1x2x6xf32>
      %19 = vector.shape_cast %18 : vector<1x2x6xf32> to vector<2x6xf32>
      %20 = vector.broadcast %12 : i32 to vector<2x6xi32>
      %21 = arith.cmpi eq, %1, %20 : vector<2x6xi32>
      %cst_5 = arith.constant 1.000000e+00 : f32
      %cst_6 = arith.constant 0.000000e+00 : f32
      %22 = vector.broadcast %cst_5 : f32 to vector<2x6xf32>
      %23 = vector.broadcast %cst_6 : f32 to vector<2x6xf32>
      %24 = arith.select %21, %22, %23 : vector<2x6xi1>, vector<2x6xf32>
      %25 = arith.mulf %19, %24 : vector<2x6xf32>
      %cst_7 = arith.constant dense<0.000000e+00> : vector<2xf32>
      %26 = vector.multi_reduction <add>, %25, %cst_7 [1] : vector<2x6xf32> to vector<2xf32>
      %27 = vector.shape_cast %26 : vector<2xf32> to vector<2x1xf32>
      %28 = vector.broadcast %16 : f32 to vector<2x1xf32>
      %29 = arith.mulf %27, %28 : vector<2x1xf32>
      %30 = vector.broadcast %arg6 : i32 to vector<2x128xi32>
      %31 = arith.cmpi eq, %2, %30 : vector<2x128xi32>
      %32 = vector.shape_cast %29 : vector<2x1xf32> to vector<2x1xf32>
      %33 = vector.broadcast %32 : vector<2x1xf32> to vector<2x128xf32>
      %34 = arith.select %31, %33, %arg7 : vector<2x128xi1>, vector<2x128xf32>
      scf.yield %34 : vector<2x128xf32>
    }
    %c128_i32_1 = arith.constant 128 : i32
    %c0 = arith.constant 0 : index
    %c0_2 = arith.constant 0 : index
    %6 = vector.load %arg5[%c0, %c0_2] : memref<2x128xf32, #tpu.memory_space<vmem>>, vector<2x128xf32>
    tpu.vector_store %arg5[%c0, %c0_2], %5 {strides = array<i32>} : memref<2x128xf32, #tpu.memory_space<vmem>>, vector<2x128xf32>,
    return
  }
  func.func @transform_0(%arg0: i32, %arg1: memref<128xi32, #tpu.memory_space<smem>>, %arg2: memref<128xi32, #tpu.memory_space<smem>>, %arg3: memref<128xi32, #tpu.memory_space<smem>>) -> (i32, i32, i32) {
    %c0_i32 = arith.constant 0 : i32
    %c0_i32_0 = arith.constant 0 : i32
    %c0_i32_1 = arith.constant 0 : i32
    %c0_i32_2 = arith.constant 0 : i32
    return %c0_i32, %c0_i32_0, %c0_i32_1 : i32, i32, i32
  }
  func.func @transform_1(%arg0: i32, %arg1: memref<128xi32, #tpu.memory_space<smem>>, %arg2: memref<128xi32, #tpu.memory_space<smem>>, %arg3: memref<128xi32, #tpu.memory_space<smem>>) -> (i32, i32) {
    %c0_i32 = arith.constant 0 : i32
    %c0_i32_0 = arith.constant 0 : i32
    return %c0_i32, %arg0 : i32, i32
  }
}

</mosaic_0001>

<bundles_post_ra>
// kernel: custom-call
= control target key start
LH: loop header
LB: loop body
LE: loop exit
PB: predicated region body
PF: predicated region fallthrough
CT: control target
= control target key end

     0   :  { %s126_s0 = inlined_call_operand.vmem [shape: f32[8], index: 0, kind: input, shape index: {}]   ;;  %s127_s1 = inlined_call_operand.vmem [shape: f32[8], index: 1, kind: input, shape index: {}]   ;;  %s128_s2 = inlined_call_operand.hbm [shape: c64[8], index: 2, kind: output, shape index: {}]  }
   0x1   :  { %s87_s11 = scalar_lea.hbm %s128_s2, 16 }
   0x2   :  { %4 = vsyncpa [#allocation0], 0  ;;  %s5_s14 = sshll.u32 %s126_s0, 4  ;;  %s6_s14 = int_to_ptr.vmem [resolvable:$true] %s5_s14 }
   0x3   :  { %s18_s15 = scalar_lea.vmem %s6_s14, 16  ;;  %p23_p1 = scmp.lt.s32.totalorder %s6_s14, %s6_s14 }
   0x4   :  { %p19_p0 = scmp.ne.s32.totalorder %s6_s14, %s18_s15  ;;  %p24_p2 = scmp.lt.s32.totalorder %s18_s15, %s18_s15 }
   0x6   :  { %p25_p3 = por %p24_p2, %p23_p1 }
   0x8   :  { %p26_p4 = pnand %p25_p3, %p19_p0 }
   0xa   :  { %29 = shalt.err (!%p26_p4)  }
   0xb   :  { %p31_p5 = scmp.ne.s32.totalorder %s128_s2, %s87_s11  ;;  %s32_s0 = scalar_lea.hbm %s128_s2, 32 }
   0xc   :  { %p33_p6 = scmp.lt.u32.totalorder %s32_s0, %s87_s11  ;;  %p34_p7 = scmp.lt.u32.totalorder %s87_s11, %s128_s2 }
   0xe   :  { %p35_p8 = por %p34_p7, %p33_p6 }
  0x10   :  { %p36_p9 = pnand %p35_p8, %p31_p5 }
  0x12   :  { %39 = shalt.err (!%p36_p9)  }
  0x13   :  { %8 = dma.vmem_to_hbm [thread:$0]  %s6_s14, 16, %s128_s2, [#allocation0] }
  0x14   :  { %65 = dma.done.wait [#allocation0], 16  }
  0x15   :  { %66 = vsyncadd [#allocation0], 4294967280 }
  0x16   :  { %10 = vsyncpa [#allocation0], 1 }
  0x17   :  { %11 = vsyncpa [#allocation1], 0  ;;  %s12_s28 = sshll.u32 %s127_s1, 4  ;;  %s13_s28 = int_to_ptr.vmem [resolvable:$true] %s12_s28 }
  0x18   :  { %s40_s29 = scalar_lea.vmem %s13_s28, 16  ;;  %p45_p11 = scmp.lt.s32.totalorder %s13_s28, %s13_s28 }
  0x19   :  { %p41_p10 = scmp.ne.s32.totalorder %s13_s28, %s40_s29  ;;  %p46_p12 = scmp.lt.s32.totalorder %s40_s29, %s40_s29 }
  0x1b   :  { %p47_p13 = por %p46_p12, %p45_p11 }
  0x1d   :  { %p48_p0 = pnand %p47_p13, %p41_p10 }
  0x1f   :  { %51 = shalt.err (!%p48_p0)  }
  0x20   :  { %p53_p1 = scmp.ne.s32.totalorder %s87_s11, %s32_s0  ;;  %p56_p2 = scmp.lt.u32.totalorder %s32_s0, %s32_s0 }
  0x22   :  { %p57_p3 = por %p56_p2, %p34_p7 }
  0x24   :  { %p59_p4 = por %p57_p3, %p33_p6 }
  0x26   :  { %p60_p5 = pnand %p59_p4, %p53_p1 }
  0x28   :  { %63 = shalt.err (!%p60_p5)  }
  0x29   :  { %15 = dma.vmem_to_hbm [thread:$0]  %s13_s28, 16, %s87_s11, [#allocation1] }
  0x2a   :  { %67 = dma.done.wait [#allocation1], 16  }
  0x2b   :  { %68 = vsyncadd [#allocation1], 4294967280 }
  0x2c   :  { %17 = vsyncpa [#allocation1], 1 }

// kernel: _forward.3
= control target key start
LH: loop header
LB: loop body
LE: loop exit
PB: predicated region body
PF: predicated region fallthrough
CT: control target
= control target key end

     0   :  { %s195_s0 = inlined_call_operand.vmem [shape: s32[128], index: 0, kind: input, shape index: {}]   ;;  %s196_s3 = inlined_call_operand.vmem [shape: f32[6,2,6], index: 3, kind: input, shape index: {}]   ;;  %s197_s4 = inlined_call_operand.vmem [shape: f32[2,128], index: 4, kind: output, shape index: {}]   ;;  %s198_s1 = inlined_call_operand.vmem [shape: s32[128], index: 1, kind: input, shape index: {}]   ;;  %s199_s2 = inlined_call_operand.vmem [shape: s32[128], index: 2, kind: input, shape index: {}]  }
   0x1   :  { %s9_s17 = sshll.u32 %s195_s0, 4  ;;  %s13_s20 = sshll.u32 %s198_s1, 4  ;;  %s10_s17 = int_to_ptr.vmem [resolvable:$true] %s9_s17  ;;  %s14_s20 = int_to_ptr.vmem [resolvable:$true] %s13_s20 }
   0x2   :  { %s92_s21 = scalar_lea.vmem %s10_s17, 16  ;;  %p97_p1 = scmp.lt.s32.totalorder %s10_s17, %s10_s17 }
   0x3   :  { %p93_p0 = scmp.ne.s32.totalorder %s10_s17, %s92_s21  ;;  %p98_p2 = scmp.lt.s32.totalorder %s92_s21, %s92_s21 }
   0x5   :  { %p99_p3 = por %p98_p2, %p97_p1 }
   0x7   :  { %p100_p4 = pnand %p99_p3, %p93_p0 }
   0x9   :  { %103 = shalt.err (!%p100_p4)  }
   0xa   :  { %s146_s22 = smov [#allocation3]   ;;  %s104_s23 = scalar_lea.vmem %s14_s20, 16 }
   0xb   :  { %12 = dma.vmem_to_smem %s10_s17, 16, %s146_s22, [#allocation2] }
   0xc   :  { %p105_p5 = scmp.ne.s32.totalorder %s14_s20, %s104_s23  ;;  %p109_p6 = scmp.lt.s32.totalorder %s14_s20, %s14_s20 }
   0xd   :  { %p110_p7 = scmp.lt.s32.totalorder %s104_s23, %s104_s23 }
   0xf   :  { %p111_p8 = por %p110_p7, %p109_p6 }
  0x11   :  { %p112_p9 = pnand %p111_p8, %p105_p5 }
  0x13   :  { %115 = shalt.err (!%p112_p9)  }
  0x14   :  { %s147_s0 = smov [#allocation4]   ;;  %s17_s25 = sshll.u32 %s199_s2, 4  ;;  %s18_s25 = int_to_ptr.vmem [resolvable:$true] %s17_s25 }
  0x15   :  { %16 = dma.vmem_to_smem %s14_s20, 16, %s147_s0, [#allocation2] }
  0x16   :  { %s116_s26 = scalar_lea.vmem %s18_s25, 16  ;;  %p121_p11 = scmp.lt.s32.totalorder %s18_s25, %s18_s25 }
  0x17   :  { %p117_p10 = scmp.ne.s32.totalorder %s18_s25, %s116_s26  ;;  %p122_p12 = scmp.lt.s32.totalorder %s116_s26, %s116_s26 }
  0x19   :  { %p123_p13 = por %p122_p12, %p121_p11 }
  0x1b   :  { %p124_p0 = pnand %p123_p13, %p117_p10 }
  0x1d   :  { %127 = shalt.err (!%p124_p0)  }
  0x1e   :  { %s148_s27 = smov [#allocation5]  }
  0x1f   :  { %20 = dma.vmem_to_smem %s18_s25, 16, %s148_s27, [#allocation2] }
  0x20   :  { %136 = dma.done.wait [#allocation2], 48 }
  0x21   :  { %137 = vsyncadd [#allocation2], 4294967248 }
  0x22   :  { %22 = sfence }
  0x23   :  { %v26_v0 = vlaneseq  ;;  %v138_v2 = vmov 0.0   ;;  %s184_s28 = smov 0  }
  0x25   :  { %v27_v1 = vand.u32 127, %v26_v0 }
  0x26 LB: > { %s36_s2 = sld [smem:[#allocation3 + %s144_s28]]  ;;  %v149_v5 = vmov 0.0   ;;  %vm47_vm1 = vcmask 41984   ;;  %v53_v9 = vstv %s144_s28  ;;  %s144_s28 = sphi %s184_s28, %s33_s28   ;;  %v140_v2 = vphi %v138_v2, %v139_v2  }
  0x27   : > { %s37_s29 = sld [smem:[#allocation4 + %s144_s28]]  ;;  %vm54_vm2 = vcmp.eq.s32.totalorder %v27_v1, %v53_v9 }
  0x28   : > { %s38_s8 = sld [smem:[#allocation5 + %s144_s28]]  ;;  %s33_s28 = sadd.s32 1, %s144_s28  }
  0x29   : > { %p30_p1 = scmp.ge.s32.totalorder %s33_s28, 128  }
  0x2c   : > { %s71_s30 = sshll.u32 %s36_s2, 1 }
  0x2d   : > { %v43_v3 = vstv %s37_s29  ;;  %s41_s7 = scalar_lea.vmem %s196_s3, %s71_s30 }
  0x2e   : > { %vm44_vm0 = vcmp.eq.s32.totalorder %v27_v1, %v43_v3  ;;  %v42_v4 = vld [vmem:[%s41_s7] sm:$0x3]  ;;  %s39_s9 = scvt.s32.f32 %s38_s8 }
  0x2f   : > { %v45_v6 = vsel %vm44_vm0, 1.0, %v149_v5 }
  0x30   : > { %v46_v7 = vmul.f32 %v45_v6, %v42_v4  ;;  %v51_v10 = vstv %s39_s9 }
  0x32   : > { %v48_v8 = vsel %vm47_vm1, %v46_v7, 0.0 }
  0x33   : > { %49 = vadd.xlane.f32.xlu0 %v48_v8 }
  0xbe   :  { %32 = sbr.rel (!%p30_p1) target bundleno = 38 (0x26), region = 32 }
  0xc0   : > { %v50_v11 = vpop.xlane.xlu0 %49 }
  0xc1   : > { %v52_v12 = vmul.f32 %v51_v10, %v50_v11 }
  0xc3   : > { %v55_v13 = vsel %vm54_vm2, %v52_v12, %v140_v2  }
  0xc4   : > { %v139_v2 = vmov %v55_v13   ;;  %56 = vst [vmem:[%s197_s4] sm:$0x3] (%p30_p1), %v55_v13 }

// kernel: _forward.2
= control target key start
LH: loop header
LB: loop body
LE: loop exit
PB: predicated region body
PF: predicated region fallthrough
CT: control target
= control target key end

     0   :  { %v234_v0 = vmov 0.0   ;;  %vm235_vm0 = vmmov 0   ;;  %vm28_vm1 = vcmask 1043456   ;;  %v236_v7 = vmov 0   ;;  %s297_s0 = inlined_call_operand.vmem [shape: s32[2,8,128], index: 0, kind: input, shape index: {}]   ;;  %s298_s1 = inlined_call_operand.vmem [shape: s32[8,3], index: 1, kind: input, shape index: {}]   ;;  %s299_s2 = inlined_call_operand.vmem [shape: s32[8,3], index: 2, kind: input, shape index: {}]   ;;  %s300_s3 = inlined_call_operand.vmem [shape: bf16[8,8], index: 3, kind: input, shape index: {}]   ;;  %s301_s4 = inlined_call_operand.vmem [shape: s32[3,128], index: 4, kind: output, shape index: {}]  }
   0x1   :  { %207 = vmatprep.subr.bf16.mxu0 %v234_v0  ;;  %213 = vmatprep.subr.bf16.mxu1 %v234_v0  ;;  %v267_v1 = vld [vmem:[%s297_s0] sm:$0xff]  ;;  %v272_v2 = vld [vmem:[%s297_s0 + $0x8] sm:$0xff]  ;;  %vm24_vm2 = vcmask 64512   ;;  %v237_v13 = vmov 1   ;;  %v238_v14 = vmov 2   ;;  %v189_v63 = vlaneseq }
   0x2   :  { %v22_v3 = vcvt.s32.f32 %v267_v1  ;;  %v105_v4 = vcvt.s32.f32 %v272_v2  ;;  %209 = vmatprep.mubr.msk.bf16.mxu0 %vm235_vm0, %v234_v0  ;;  %215 = vmatprep.mubr.msk.bf16.mxu1 %vm235_vm0, %v234_v0  ;;  %v74_v5 = vld [vmem:[%s298_s1] sm:$0xff]  ;;  %v99_v17 = vrot.slane %v267_v1, 4  ;;  %v177_v18 = vrot.slane %v272_v2, 4 }
   0x3   :  { %v152_v6 = vld [vmem:[%s299_s2] sm:$0xff]  ;;  %230 = vset.pattern.permute.xlu1 %v236_v7  ;;  %228 = vset.pattern.permute.xlu0 %v236_v7 }
   0x4   :  { %v23_v8 = vpack.c.bf16 %v22_v3, %v22_v3  ;;  %v106_v9 = vpack.c.bf16 %v105_v4, %v105_v4  ;;  %77 = vperm.xlu1 %230, %v74_v5   ;;  %155 = vperm.xlu0 %228, %v152_v6   ;;  %v18_v12 = vld [vmem:[%s300_s3] sm:$0xf]  ;;  %v100_v19 = vadd.s32 %v99_v17, %v267_v1 }
   0x5   :  { %v178_v20 = vadd.s32 %v272_v2, %v177_v18 }
   0x6   :  { %v30_v10 = vsel %vm28_vm1, %v23_v8, 0  ;;  %v108_v11 = vsel %vm28_vm1, %v106_v9, 0  ;;  %v101_v29 = vrot.slane %v100_v19, 2 }
   0x7   :  { %208 = vmatpush3.bf16.msra.mxu0 %v30_v10  ;;  %214 = vmatpush3.bf16.msra.mxu1 %v108_v11  ;;  %v179_v30 = vrot.slane %v178_v20, 2 }
   0x8   :  { %231 = vset.pattern.permute.xlu1 %v237_v13  ;;  %229 = vset.pattern.permute.xlu0 %v237_v13  ;;  %v102_v39 = vadd.s32 %v101_v29, %v100_v19 }
   0x9   :  { %82 = vperm.xlu1 %231, %v74_v5   ;;  %160 = vperm.xlu0 %229, %v152_v6   ;;  %v180_v40 = vadd.s32 %v179_v30, %v178_v20 }
   0xa   :  { %210 = vmatmul.mubr.msk.bf16.vlgmr.msra.gmra.mrb[0].mxu0 %vm24_vm2, %v18_v12  ;;  %216 = vmatmul.mubr.msk.bf16.vlgmr.msra.gmra.mrb[0].mxu1 %vm24_vm2, %v18_v12  ;;  %v103_v49 = vrot.slane %v102_v39, 1 }
   0xb   :  { %v181_v50 = vrot.slane %v180_v40, 1 }
   0xc   :  { %v104_v57 = vadd.s32 %v103_v49, %v102_v39 }
   0xd   :  { %232 = vset.pattern.permute.xlu1 %v238_v14  ;;  %233 = vset.pattern.permute.xlu0 %v238_v14  ;;  %v182_v58 = vadd.s32 %v181_v50, %v180_v40 }
   0xe   :  { %166 = vperm.xlu1 %232, %v152_v6   ;;  %88 = vperm.xlu0 %233, %v74_v5   ;;  %vm183_vm9 = vcmp.eq.s32.totalorder %v104_v57, 2  ;;  %v190_v6 = vshrl.u32 %v189_v63, 7 }
   0xf   :  { %vm184_vm10 = vcmp.eq.s32.totalorder %v182_v58, 2 }
  0x10   :  { %vm185_vm11 = vmand %vm183_vm9, %vm184_vm10  ;;  %vm192_vm12 = vcmp.eq.s32.totalorder %v190_v6, 1  ;;  %vm191_vm13 = vcmp.eq.s32.totalorder %v190_v6, 0 }
  0x83   :  { %v78_v15 = vpop.permute.xlu1 %77  ;;  %v156_v16 = vpop.permute.xlu0 %155 }
  0x88   :  { %v83_v21 = vpop.permute.xlu1 %82  ;;  %v161_v22 = vpop.permute.xlu0 %160 }
  0x8d   :  { %v167_v41 = vpop.permute.xlu1 %166  ;;  %v89_v42 = vpop.permute.xlu0 %88 }
  0xdd   :  { %v66_v23 = vpop.f32.mrb[0].mxu0  ;;  %v144_v24 = vpop.f32.mrb[0].mxu1 }
  0xde   :  { %v219_v25 = vtrunc.f32 %v66_v23  ;;  %v221_v26 = vtrunc.f32 %v144_v24  ;;  %v211_v27 = vpop.f32.mrb[1].mxu0  ;;  %v217_v28 = vpop.f32.mrb[1].mxu1 }
  0xdf   :  { %v69_v31 = vpop.f32.mrb[2].mxu0  ;;  %v147_v32 = vpop.f32.mrb[2].mxu1 }
  0xe0   :  { %v220_v33 = vcvt.f32.s32 %v219_v25  ;;  %v222_v34 = vcvt.f32.s32 %v221_v26  ;;  %v212_v35 = vpop.f32.mrb[3].mxu0  ;;  %v218_v36 = vpop.f32.mrb[3].mxu1 }
  0xe2   :  { %v73_v37 = vsub.s32 2, %v220_v33  ;;  %v151_v38 = vsub.s32 2, %v222_v34 }
  0xe4   :  { %vm75_vm3 = vcmp.eq.s32.totalorder %v73_v37, 0  ;;  %vm80_vm4 = vcmp.eq.s32.totalorder %v73_v37, 1  ;;  %vm153_vm5 = vcmp.eq.s32.totalorder %v151_v38, 0  ;;  %vm158_vm6 = vcmp.eq.s32.totalorder %v151_v38, 1 }
  0xe5   :  { %v79_v43 = vsel %vm75_vm3, %v78_v15, 0  ;;  %v84_v44 = vsel %vm80_vm4, %v83_v21, 0  ;;  %v157_v45 = vsel %vm153_vm5, %v156_v16, 0  ;;  %v162_v46 = vsel %vm158_vm6, %v161_v22, 0 }
  0xe6   :  { %v85_v47 = vadd.s32 %v84_v44, %v79_v43  ;;  %v163_v48 = vadd.s32 %v162_v46, %v157_v45  ;;  %vm164_vm7 = vcmp.eq.s32.totalorder %v151_v38, 2  ;;  %vm86_vm8 = vcmp.eq.s32.totalorder %v73_v37, 2 }
  0xe7   :  { %v168_v51 = vsel %vm164_vm7, %v167_v41, 0  ;;  %v90_v52 = vsel %vm86_vm8, %v89_v42, 0 }
  0xe8   :  { %v169_v53 = vadd.s32 %v168_v51, %v163_v48  ;;  %v91_v54 = vadd.s32 %v90_v52, %v85_v47 }
  0xea   :  { %v170_v55 = vmul.u32 %v272_v2, %v169_v53  ;;  %v92_v56 = vmul.u32 %v91_v54, %v267_v1  ;;  %v186_v2 = vsel %vm185_vm11, 1, %v236_v7 }
  0xec   :  { %v171_v59 = vrot.slane %v170_v55, 4  ;;  %v93_v60 = vrot.slane %v92_v56, 4 }
  0xee   :  { %v172_v61 = vadd.s32 %v171_v59, %v170_v55  ;;  %v94_v62 = vadd.s32 %v93_v60, %v92_v56 }
  0xf0   :  { %v173_v0 = vrot.slane %v172_v61, 2  ;;  %v95_v3 = vrot.slane %v94_v62, 2 }
  0xf2   :  { %v174_v4 = vadd.s32 %v173_v0, %v172_v61  ;;  %v96_v5 = vadd.s32 %v95_v3, %v94_v62 }
  0xf4   :  { %v175_v8 = vrot.slane %v174_v4, 1  ;;  %v97_v9 = vrot.slane %v96_v5, 1 }
  0xf6   :  { %v176_v1 = vadd.s32 %v175_v8, %v174_v4  ;;  %v98_v10 = vadd.s32 %v97_v9, %v96_v5 }
  0xf8   :  { %v188_v11 = vmul.u32 %v186_v2, %v176_v1  ;;  %v187_v12 = vmul.u32 %v186_v2, %v98_v10 }
  0xfa   :  { %v193_v13 = vsel %vm192_vm12, %v188_v11, %v186_v2 }
  0xfb   :  { %v194_v14 = vsel %vm191_vm13, %v187_v12, %v193_v13 }
  0xfc   :  { %195 = vst [vmem:[%s301_s4] sm:$0x7] %v194_v14 }

</bundles_post_ra>
